<compile_context>
chip_gen: v7x
topology: tpu7x:2x2x1
jax: 0.10.0
libtpu: 0.0.40
codegen_flags: <defaults>
</compile_context>

<pallas_src>
import functools
import math

import jax
import jax.numpy as jnp
from jax.experimental import pallas as pl
from jax.experimental.pallas import tpu as pltpu


def _round_up(a, b):
    return (a + b - 1) // b * b


# ----------------------------------------------------------------------------
# Fused conv3x3 + (folded BN) bias + ReLU Pallas kernel.
#
# Input layout (built in the wrapper): the spatially zero-padded image is
# turned into xflat of shape (N, (H+2)*W, 3*Cin), where flat row yp*W + x holds
# concat(xpad[yp, x], xpad[yp, x+1], xpad[yp, x+2]) over channels (the kx
# window for output column x).  Output pixel (y, x) = flat row y*W + x is then
#     sum_{ky in 0..2}  xflat[(y+ky)*W + x, :] @ w[ky]        (w: (3, 3Cin, Cout))
# so a chunk of `chunk` consecutive output rows needs, per ky, one contiguous
# `chunk`-row slice at offset ky*W — aligned when W and chunk are multiples
# of 8.  No junk columns are ever computed.
# ----------------------------------------------------------------------------
def _conv3x3_kernel(x_ref, w_ref, b_ref, o_ref, *, width):
    # x_ref: (nb, (H+2)*W, 3*Cin) bf16 ; w_ref: (3, 3*Cin, Cout) bf16
    # b_ref: (1, Cout) f32             ; o_ref: (nb, chunk, Cout) bf16
    nb, chunk, cout = o_ref.shape
    c = pl.program_id(1)
    s = c * chunk
    aligned = (width % 8 == 0) and (chunk % 8 == 0)

    acc = None
    for ky in range(3):                       # 3 matmuls, K = 3*Cin each
        base = s + ky * width
        if aligned:
            base = pl.multiple_of(base, 8)
        parts = [x_ref[ib, pl.ds(base, chunk), :] for ib in range(nb)]
        lhs = parts[0] if nb == 1 else jnp.concatenate(parts, axis=0)
        part = jnp.dot(lhs, w_ref[ky], preferred_element_type=jnp.float32)
        acc = part if acc is None else acc + part

    y = jnp.maximum(acc + b_ref[...], 0.0)                     # f32 epilogue
    o_ref[...] = y.reshape(nb, chunk, cout).astype(o_ref.dtype)


def _pick_chunk(q):
    """Largest chunk <= 256 that is a multiple of 8 and divides q (else q)."""
    if q <= 256:
        return q
    for c in range(256, 7, -8):
        if q % c == 0:
            return c
    return q


def _pick_nb(n, q):
    """Batch several images per grid step for small feature maps (raise MXU M)."""
    if q > 128 or q % 8 != 0:
        return 1
    cap = max(1, 256 // q)
    for d in range(min(n, cap), 0, -1):
        if n % d == 0:
            return d
    return 1


def conv3x3_bn_relu(x_nhwc, w3, bias):
    """x_nhwc: (N,H,W,Cin) -> (N,H,W,Cout). w3: (3, 3*Cin, Cout) bf16, bias: (1,Cout) f32."""
    N, H, W, Cin = x_nhwc.shape
    K = 3 * Cin
    Cout = w3.shape[-1]
    assert w3.shape == (3, K, Cout)

    xp = jnp.pad(x_nhwc.astype(jnp.bfloat16), ((0, 0), (1, 1), (1, 1), (0, 0)))
    # kx = 0,1,2 column windows concatenated along channels -> (N, H+2, W, 3*Cin)
    xcat = jnp.concatenate(
        [xp[:, :, 0:W, :], xp[:, :, 1:W + 1, :], xp[:, :, 2:W + 2, :]], axis=-1)
    P = (H + 2) * W
    Q = H * W
    xflat = xcat.reshape(N, P, K)

    chunk = _pick_chunk(Q)
    nb = _pick_nb(N, Q)

    kernel = functools.partial(_conv3x3_kernel, width=W)
    out = pl.pallas_call(
        kernel,
        out_shape=jax.ShapeDtypeStruct((N, Q, Cout), jnp.bfloat16),
        grid_spec=pltpu.PrefetchScalarGridSpec(
            num_scalar_prefetch=0,
            grid=(N // nb, Q // chunk),
            in_specs=[
                pl.BlockSpec((nb, P, K), lambda b, c: (b, 0, 0)),     # resident per batch-block
                pl.BlockSpec((3, K, Cout), lambda b, c: (0, 0, 0)),   # resident weights
                pl.BlockSpec((1, Cout), lambda b, c: (0, 0)),
            ],
            out_specs=pl.BlockSpec((nb, chunk, Cout), lambda b, c: (b, c, 0)),
        ),
        compiler_params=pltpu.CompilerParams(
            dimension_semantics=("parallel", "parallel"),   # v7x: both TCs busy
        ),
    )(xflat, w3, bias)

    # Dense rows -> NHWC is a pure metadata reshape (no pad/slice glue).
    return out.reshape(N, H, W, Cout)


# ----------------------------------------------------------------------------
# Fused Linear kernel: out = maybe_relu(x @ w + b).
# Output features are blocked (grid axis j) so large weights (FC1: 512x4096)
# are streamed block-by-block and the DMA overlaps the MXU.
# ----------------------------------------------------------------------------
def _linear_kernel(x_ref, w_ref, b_ref, o_ref, *, relu):
    y = jnp.dot(x_ref[...], w_ref[...], preferred_element_type=jnp.float32) + b_ref[...]
    if relu:
        y = jnp.maximum(y, 0.0)
    o_ref[...] = y.astype(o_ref.dtype)


def linear(x, w, b, *, relu, out_dtype=jnp.float32, tn=512, tm=256):
    """x:(M,K) @ w:(K,N) + b:(1,N).  M padded to 8, N padded to lane-dense 128."""
    M, K = x.shape
    Kw, N = w.shape
    assert K == Kw
    Np = _round_up(N, 128)
    if Np != N:
        w = jnp.pad(w, ((0, 0), (0, Np - N)))
        b = jnp.pad(b, ((0, 0), (0, Np - N)))
    tn = min(tn, Np)
    while Np % tn:
        tn //= 2
    Mp = _round_up(M, 8)
    tm = min(tm, Mp)
    Mp = _round_up(Mp, tm)
    if Mp != M:
        x = jnp.pad(x, ((0, Mp - M), (0, 0)))

    x = x.astype(jnp.bfloat16)
    w = w.astype(jnp.bfloat16)
    b = b.astype(jnp.float32)

    out = pl.pallas_call(
        functools.partial(_linear_kernel, relu=relu),
        out_shape=jax.ShapeDtypeStruct((Mp, Np), out_dtype),
        grid_spec=pltpu.PrefetchScalarGridSpec(
            num_scalar_prefetch=0,
            grid=(Mp // tm, Np // tn),
            in_specs=[
                pl.BlockSpec((tm, K), lambda i, j: (i, 0)),
                pl.BlockSpec((K, tn), lambda i, j: (0, j)),   # streamed weight blocks
                pl.BlockSpec((1, tn), lambda i, j: (0, j)),
            ],
            out_specs=pl.BlockSpec((tm, tn), lambda i, j: (i, j)),
        ),
        compiler_params=pltpu.CompilerParams(
            dimension_semantics=("parallel", "parallel"),
        ),
    )(x, w, b)
    return out[:M, :N]


# ----------------------------------------------------------------------------
# Plain-JAX glue
# ----------------------------------------------------------------------------
def maxpool2x2(x):
    # TODO(synk): could be fused into the preceding conv kernel epilogue.
    N, H, W, C = x.shape
    return x.reshape(N, H // 2, 2, W // 2, 2, C).max(axis=(2, 4))


# ----------------------------------------------------------------------------
# Model definition
# ----------------------------------------------------------------------------
CFG = [(3, 64), (64, 64), 'M',
       (64, 128), (128, 128), 'M',
       (128, 256), (256, 256), (256, 256), 'M',
       (256, 512), (512, 512), (512, 512), 'M',
       (512, 512), (512, 512), (512, 512), 'M']

NUM_CLASSES = 13


def init_params(key, num_classes=NUM_CLASSES):
    eps = 1e-5
    features = []
    for idx, item in enumerate(CFG):
        if item == 'M':
            continue
        cin, cout = item
        k = jax.random.fold_in(key, idx)
        kw, kb, kg, kbeta, km, kv = jax.random.split(k, 6)
        w = jax.random.normal(kw, (3, 3, cin, cout), jnp.float32) / math.sqrt(9 * cin)
        conv_b = 0.01 * jax.random.normal(kb, (cout,), jnp.float32)
        gamma = 1.0 + 0.1 * jax.random.normal(kg, (cout,), jnp.float32)
        beta = 0.1 * jax.random.normal(kbeta, (cout,), jnp.float32)
        mean = 0.1 * jax.random.normal(km, (cout,), jnp.float32)
        var = 1.0 + 0.1 * jnp.abs(jax.random.normal(kv, (cout,), jnp.float32))
        # Fold BN (inference) into the conv: scale into weights, shift into bias.
        scale = gamma / jnp.sqrt(var + eps)
        bias = (conv_b - mean) * scale + beta
        # (3, 3, Cin, Cout) -> (3, 3*Cin, Cout): per-ky weight with kx-major K.
        w_folded = (w * scale[None, None, None, :]).reshape(3, 3 * cin, cout)
        features.append((w_folded.astype(jnp.bfloat16),
                         bias.reshape(1, cout).astype(jnp.float32)))

    kf1w = jax.random.fold_in(key, 1000)
    kf1b = jax.random.fold_in(key, 1001)
    kf2w = jax.random.fold_in(key, 1002)
    kf2b = jax.random.fold_in(key, 1003)
    fc1_w = (jax.random.normal(kf1w, (512, 4096), jnp.float32)
             / math.sqrt(512)).astype(jnp.bfloat16)
    fc1_b = 0.01 * jax.random.normal(kf1b, (4096,), jnp.float32)
    fc2_w = (jax.random.normal(kf2w, (4096, num_classes), jnp.float32)
             / math.sqrt(4096)).astype(jnp.bfloat16)
    fc2_b = 0.01 * jax.random.normal(kf2b, (num_classes,), jnp.float32)
    return {"features": features,
            "fc1": (fc1_w, fc1_b.reshape(1, -1)),
            "fc2": (fc2_w, fc2_b.reshape(1, -1))}


def deep_single_branch_cnn_forward(x_nchw, params):
    """x_nchw: (N, 3, H, W) float32 -> logits (N, num_classes)."""
    x = jnp.transpose(x_nchw, (0, 2, 3, 1)).astype(jnp.bfloat16)  # NCHW -> NHWC
    layer = 0
    for item in CFG:
        if item == 'M':
            x = maxpool2x2(x)
        else:
            w3, bias = params["features"][layer]
            layer += 1
            x = conv3x3_bn_relu(x, w3, bias)

    # AdaptiveAvgPool2d((1,1)) + Flatten
    x = jnp.mean(x.astype(jnp.float32), axis=(1, 2))  # (N, 512)

    fc1_w, fc1_b = params["fc1"]
    x = linear(x, fc1_w, fc1_b, relu=True, out_dtype=jnp.bfloat16)

    # TODO(synk): Dropout(0.5) is identity here (inference mode); no RNG mask applied.

    fc2_w, fc2_b = params["fc2"]
    x = linear(x, fc2_w, fc2_b, relu=False, out_dtype=jnp.float32)
    return x


if __name__ == "__main__":
    key = jax.random.PRNGKey(0)
    params = init_params(jax.random.fold_in(key, 7))
    # Small input consistent with the module: 5 maxpools need spatial >= 32.
    x = jax.random.normal(key, (2, 3, 32, 32), jnp.float32)

    # Sanity check: fused conv kernel vs lax.conv reference on layers 1 and 2
    # (same bf16-rounded operands, f32 accumulation -> difference is tiny).
    a = jnp.transpose(x, (0, 2, 3, 1)).astype(jnp.bfloat16)
    for li in range(2):
        w3, bias = params["features"][li]
        cin = w3.shape[1] // 3
        cout = w3.shape[2]
        got = conv3x3_bn_relu(a, w3, bias).astype(jnp.float32)
        wref = w3.astype(jnp.float32).reshape(3, 3, cin, cout)
        ref = jax.lax.conv_general_dilated(
            a.astype(jnp.float32), wref, window_strides=(1, 1), padding="SAME",
            dimension_numbers=("NHWC", "HWIO", "NHWC"),
            precision=jax.lax.Precision.HIGHEST)
        ref = jnp.maximum(ref + bias.reshape(1, 1, 1, -1), 0.0)
        err = float(jnp.max(jnp.abs(got - ref)))
        tol = 2e-2 * (1.0 + float(jnp.max(jnp.abs(ref))))
        assert err < tol, f"layer {li}: fused conv mismatch, err={err} tol={tol}"
        a = got.astype(jnp.bfloat16)

    fwd = jax.jit(deep_single_branch_cnn_forward)
    out = jax.block_until_ready(fwd(x, params))
    assert out.shape == (2, NUM_CLASSES), out.shape
    assert bool(jnp.all(jnp.isfinite(out)))
    print("KERNEL_OK")
</pallas_src>

<mosaic_0001>
module attributes {stable_mosaic.version = 11 : i64} {
  func.func @_conv3x3_kernel(%arg0: i32, %arg1: i32, %arg2: memref<1x1088x9xbf16, #tpu.memory_space<vmem>>, %arg3: memref<3x9x64xbf16, #tpu.memory_space<vmem>>, %arg4: memref<1x64xf32, #tpu.memory_space<vmem>>, %arg5: memref<1x256x64xbf16, #tpu.memory_space<vmem>>) attributes {dimension_semantics = [#tpu.dimension_semantics<parallel>, #tpu.dimension_semantics<parallel>], iteration_bounds = array<i64: 2, 4>, scalar_prefetch = 0 : i64, scratch_operands = 0 : i64, tpu.core_type = #tpu.core_type<tc>, window_params = [{transform_indices = @transform_0, window_bounds = array<i64: 1, 1088, 9>}, {pipeline_mode = #tpu.pipeline_mode<synchronous>, transform_indices = @transform_1, window_bounds = array<i64: 3, 9, 64>}, {pipeline_mode = #tpu.pipeline_mode<synchronous>, transform_indices = @transform_2, window_bounds = array<i64: 1, 64>}, {transform_indices = @transform_3, window_bounds = array<i64: 1, 256, 64>}]} {
    %c256_i32 = arith.constant 256 : i32
    %0 = arith.muli %arg1, %c256_i32 : i32
    %c0_i32 = arith.constant 0 : i32
    %1 = arith.addi %0, %c0_i32 : i32
    %2 = tpu.assume_multiple %1, 8 : i32
    %c0 = arith.constant 0 : index
    %3 = arith.index_cast %2 : i32 to index
    %c0_0 = arith.constant 0 : index
    %4 = vector.load %arg2[%c0, %3, %c0_0] : memref<1x1088x9xbf16, #tpu.memory_space<vmem>>, vector<1x256x9xbf16>
    %5 = vector.shape_cast %4 : vector<1x256x9xbf16> to vector<256x9xbf16>
    %c0_1 = arith.constant 0 : index
    %c0_2 = arith.constant 0 : index
    %c0_3 = arith.constant 0 : index
    %6 = vector.load %arg3[%c0_1, %c0_2, %c0_3] : memref<3x9x64xbf16, #tpu.memory_space<vmem>>, vector<1x9x64xbf16>
    %7 = vector.shape_cast %6 : vector<1x9x64xbf16> to vector<9x64xbf16>
    %cst = arith.constant dense<0.000000e+00> : vector<256x64xf32>
    %8 = tpu.matmul %5, %7, %cst {dimension_numbers = #tpu.dot_dimension_numbers<[1], [0], [0], [1], [0, 0, 1, 1], [], []>} : vector<256x9xbf16>, vector<9x64xbf16>, vector<256x64xf32> -> vector<256x64xf32>
    %c32_i32 = arith.constant 32 : i32
    %9 = arith.addi %0, %c32_i32 : i32
    %10 = tpu.assume_multiple %9, 8 : i32
    %c0_4 = arith.constant 0 : index
    %11 = arith.index_cast %10 : i32 to index
    %c0_5 = arith.constant 0 : index
    %12 = vector.load %arg2[%c0_4, %11, %c0_5] : memref<1x1088x9xbf16, #tpu.memory_space<vmem>>, vector<1x256x9xbf16>
    %13 = vector.shape_cast %12 : vector<1x256x9xbf16> to vector<256x9xbf16>
    %c1 = arith.constant 1 : index
    %c0_6 = arith.constant 0 : index
    %c0_7 = arith.constant 0 : index
    %14 = vector.load %arg3[%c1, %c0_6, %c0_7] : memref<3x9x64xbf16, #tpu.memory_space<vmem>>, vector<1x9x64xbf16>
    %15 = vector.shape_cast %14 : vector<1x9x64xbf16> to vector<9x64xbf16>
    %cst_8 = arith.constant dense<0.000000e+00> : vector<256x64xf32>
    %16 = tpu.matmul %13, %15, %cst_8 {dimension_numbers = #tpu.dot_dimension_numbers<[1], [0], [0], [1], [0, 0, 1, 1], [], []>} : vector<256x9xbf16>, vector<9x64xbf16>, vector<256x64xf32> -> vector<256x64xf32>
    %17 = arith.addf %8, %16 : vector<256x64xf32>
    %c64_i32 = arith.constant 64 : i32
    %18 = arith.addi %0, %c64_i32 : i32
    %19 = tpu.assume_multiple %18, 8 : i32
    %c0_9 = arith.constant 0 : index
    %20 = arith.index_cast %19 : i32 to index
    %c0_10 = arith.constant 0 : index
    %21 = vector.load %arg2[%c0_9, %20, %c0_10] : memref<1x1088x9xbf16, #tpu.memory_space<vmem>>, vector<1x256x9xbf16>
    %22 = vector.shape_cast %21 : vector<1x256x9xbf16> to vector<256x9xbf16>
    %c2 = arith.constant 2 : index
    %c0_11 = arith.constant 0 : index
    %c0_12 = arith.constant 0 : index
    %23 = vector.load %arg3[%c2, %c0_11, %c0_12] : memref<3x9x64xbf16, #tpu.memory_space<vmem>>, vector<1x9x64xbf16>
    %24 = vector.shape_cast %23 : vector<1x9x64xbf16> to vector<9x64xbf16>
    %cst_13 = arith.constant dense<0.000000e+00> : vector<256x64xf32>
    %25 = tpu.matmul %22, %24, %cst_13 {dimension_numbers = #tpu.dot_dimension_numbers<[1], [0], [0], [1], [0, 0, 1, 1], [], []>} : vector<256x9xbf16>, vector<9x64xbf16>, vector<256x64xf32> -> vector<256x64xf32>
    %26 = arith.addf %17, %25 : vector<256x64xf32>
    %c0_14 = arith.constant 0 : index
    %c0_15 = arith.constant 0 : index
    %27 = vector.load %arg4[%c0_14, %c0_15] : memref<1x64xf32, #tpu.memory_space<vmem>>, vector<1x64xf32>
    %28 = vector.broadcast %27 : vector<1x64xf32> to vector<256x64xf32>
    %29 = arith.addf %26, %28 : vector<256x64xf32>
    %cst_16 = arith.constant 0.000000e+00 : f32
    %30 = vector.broadcast %cst_16 : f32 to vector<256x64xf32>
    %31 = arith.maximumf %29, %30 : vector<256x64xf32>
    %32 = vector.shape_cast %31 : vector<256x64xf32> to vector<1x256x64xf32>
    %33 = arith.truncf %32 : vector<1x256x64xf32> to vector<1x256x64xbf16>
    %c0_17 = arith.constant 0 : index
    %c0_18 = arith.constant 0 : index
    %c0_19 = arith.constant 0 : index
    %34 = vector.load %arg5[%c0_17, %c0_18, %c0_19] : memref<1x256x64xbf16, #tpu.memory_space<vmem>>, vector<1x256x64xbf16>
    tpu.vector_store %arg5[%c0_17, %c0_18, %c0_19], %33 {strides = array<i32>} : memref<1x256x64xbf16, #tpu.memory_space<vmem>>, vector<1x256x64xbf16>,
    return
  }
  func.func @transform_0(%arg0: i32, %arg1: i32) -> (i32, i32, i32) {
    %c0_i32 = arith.constant 0 : i32
    %c0_i32_0 = arith.constant 0 : i32
    %c0_i32_1 = arith.constant 0 : i32
    return %arg0, %c0_i32, %c0_i32_0 : i32, i32, i32
  }
  func.func @transform_1(%arg0: i32, %arg1: i32) -> (i32, i32, i32) {
    %c0_i32 = arith.constant 0 : i32
    %c0_i32_0 = arith.constant 0 : i32
    %c0_i32_1 = arith.constant 0 : i32
    %c0_i32_2 = arith.constant 0 : i32
    return %c0_i32, %c0_i32_0, %c0_i32_1 : i32, i32, i32
  }
  func.func @transform_2(%arg0: i32, %arg1: i32) -> (i32, i32) {
    %c0_i32 = arith.constant 0 : i32
    %c0_i32_0 = arith.constant 0 : i32
    %c0_i32_1 = arith.constant 0 : i32
    return %c0_i32, %c0_i32_0 : i32, i32
  }
  func.func @transform_3(%arg0: i32, %arg1: i32) -> (i32, i32, i32) {
    %c0_i32 = arith.constant 0 : i32
    %c0_i32_0 = arith.constant 0 : i32
    return %arg0, %arg1, %c0_i32 : i32, i32, i32
  }
}

</mosaic_0001>

<bundles_post_ra>
// kernel: tpu_custom_call.1
= control target key start
LH: loop header
LB: loop body
LE: loop exit
PB: predicated region body
PF: predicated region fallthrough
CT: control target
= control target key end

     0   :  { %s2120_s12 = smov 0   ;;  %s2122_s13 = smov 0   ;;  %s2424_s0 = inlined_call_operand.vmem [shape: bf16[2,1088,9], index: 0, kind: input, shape index: {}]   ;;  %s2425_s1 = inlined_call_operand.vmem [shape: bf16[3,9,64], index: 1, kind: input, shape index: {}]   ;;  %s2426_s2 = inlined_call_operand.vmem [shape: f32[1,64], index: 2, kind: input, shape index: {}]   ;;  %s2427_s3 = inlined_call_operand.vmem [shape: bf16[2,1024,64], index: 3, kind: output, shape index: {}]  }
   0x1   :  { %s2124_s14 = smov 0   ;;  %s2126_s15 = smov 0  }
   0x2   :  { %s2128_s16 = smov 0  }
   0x3 LB: > { %s22_s17 = sadd.s32 1, %s2089_s14  ;;  %s25_s18 = sadd.s32 1, %s2093_s15  ;;  %s2097_s16 = sphi %s2128_s16, %s13_s16   ;;  %s2093_s15 = sphi %s2126_s15, %s2431_s15   ;;  %s2089_s14 = sphi %s2124_s14, %s2430_s14   ;;  %s2085_s13 = sphi %s2122_s13, %s2429_s13   ;;  %s2081_s12 = sphi %s2120_s12, %s2428_s12  }
   0x4   : > { %p23_p0 = scmp.ge.s32.totalorder %s22_s17, 4  ;;  %p1568_p1 = scmp.ge.s32.totalorder %s2097_s16, 1 }
   0x5   : > { %p151_p2 = scmp.lt.s32.totalorder %s2097_s16, 9 }
   0x6   : > { %s2433_s17 = smov (%p23_p0, %s22_s17), 0  ;;  %s2435_s18 = smov (!%p23_p0, %s25_s18), %s2093_s15 }
   0x7   : > { %p152_p3 = pnand %p1568_p1, %p151_p2  ;;  %p27_p4 = scmp.ge.s32.totalorder %s2435_s18, 2 }
   0x8   : > { %v2008_v0 = vld [vmem:[%s2425_s1 + $0x8] sm:$0x1f] (!%p152_p3)   ;;  %vm408_vm0 = vcmask (!%p152_p3), 1043456   ;;  %vm409_vm1 = vcmask (!%p152_p3), 1044480   ;;  %v2009_v1 = vld [vmem:[%s2425_s1] sm:$0x1f] (!%p152_p3)  }
   0x9   : > { %s2437_s18 = smov (%p27_p4, %s2435_s18), 0  ;;  %155 = sbr.rel (%p152_p3) target bundleno = 336 (0x150), region = 32 }
   0xa   : > { %p179_p5 = scmp.lt.s32.totalorder (!%p152_p3), %s2085_s13, 1  ;;  %s2159_s23 = sshll.u32 (!%p152_p3), %s2081_s12, 8  ;;  %v2099_v2 = vmov (!%p152_p3), 65535   ;;  %v2012_v5 = vld [vmem:[%s2425_s1 + $0x10] sm:$0x1f] (!%p152_p3)   ;;  %vm359_vm2 = vcmask (!%p152_p3), 72704  }
   0xb   : > { %v410_v3 = vsel (!%p152_p3), %vm408_vm0, 4294967295, %v2099_v2  ;;  %s234_s24 = sadd.s32 (!%p152_p3), 32, %s2159_s23  ;;  %s196_s6 = sshra.s32 (!%p152_p3), %s2159_s23, 3  ;;  %vm1441_vm3 = vcmask (!%p152_p3), 519168  }
   0xc   : > { %v411_v4 = vsel (!%p152_p3), %vm409_vm1, %v410_v3, 0  ;;  %s235_s27 = sshra.s32 (!%p152_p3), %s234_s24, 3  ;;  %s1574_s8 = sshll.u32 (!%p152_p3), %s196_s6, 2 }
   0xd   : > { %v413_v6 = vand.u32 (!%p152_p3), %v2008_v0, %v411_v4  ;;  %v710_v7 = vand.u32 (!%p152_p3), %v2009_v1, %v411_v4  ;;  %v1047_v8 = vand.u32 (!%p152_p3), %v2012_v5, %v411_v4  ;;  %s1575_s29 = sshll.u32 (!%p152_p3), %s235_s27, 2  ;;  %s873_s10 = sadd.s32 (!%p152_p3), 64, %s2159_s23 }
   0xe   : > { %s874_s11 = sshra.s32 (!%p152_p3), %s873_s10, 3  ;;  %s1570_s21 = sshll.u32 (!%p152_p3), %s2081_s12, 5 }
   0xf   : > { %1798 = vmatprep.subr.bf16.mxu1 (!%p152_p3), %v413_v6  ;;  %1832 = vmatprep.subr.bf16.mxu0 (!%p152_p3), %v710_v7  ;;  %s1644_s19 = sshll.u32 (!%p152_p3), %s874_s11, 2  ;;  %p187_p6 = scmp.lt.s32.totalorder (!%p152_p3), %s1570_s21, 127 }
  0x10   : > { %s2439_s13 = smov (!%p179_p5, %s2085_s13), 1  ;;  %1799 = vmatpush3.bf16.msra.mxu1 %v413_v6  ;;  %1833 = vmatpush3.bf16.msra.mxu0 %v710_v7 }
  0x11   : > { %s1966_s28 = smul.u32 544, %s2439_s13  ;;  %1900 = vmatprep.subr.bf16.mxu1 %v710_v7  ;;  %1866 = vmatprep.subr.bf16.mxu0 %v1047_v8  ;;  %s2441_s21 = smov (!%p187_p6, %s1570_s21), 127 }
  0x12   : > { %s1571_s22 = sshll.u32 %s2439_s13, 7 }
  0x13   : > { %s2171_s5 = scalar_lea.vmem %s2424_s0, %s1966_s28  ;;  %s190_s23 = sadd.s32 %s1571_s22, %s2441_s21 }
  0x14   : > { %s2175_s7 = scalar_lea.vmem %s2171_s5, %s1575_s29  ;;  %s2179_s9 = scalar_lea.vmem %s2171_s5, %s1574_s8 }
  0x15   : > { %v2010_v9 = vld [vmem:[%s2175_s7] sm:$0xff]   ;;  %v2013_v10 = vld [vmem:[%s2175_s7 + $0x8] sm:$0xff]   ;;  %v2015_v13 = vld [vmem:[%s2175_s7 + $0x10] sm:$0xff]   ;;  %s2203_s20 = scalar_lea.vmem %s2171_s5, %s1644_s19  ;;  %s1572_s12 = sshll.u32 %s190_s23, 2 }
  0x16   : > { %1800 = vmatprep.mubr.msk.bf16.mxu1 %vm359_vm2, %v2010_v9  ;;  %v2011_v11 = vld [vmem:[%s2179_s9] sm:$0xff]   ;;  %v2014_v12 = vld [vmem:[%s2179_s9 + $0x8] sm:$0xff]   ;;  %v2016_v14 = vld [vmem:[%s2179_s9 + $0x10] sm:$0xff]   ;;  %s2307_s27 = scalar_lea.vmem %s2427_s3, %s1572_s12 }
  0x17   : > { %1801 = vmatmul.mubr.msk.bf16.vlgmr.msra.gmra.mrb[0].mxu1 %vm359_vm2, %v2013_v10  ;;  %1834 = vmatprep.mubr.msk.bf16.mxu0 %vm359_vm2, %v2011_v11  ;;  %v2017_v15 = vld [vmem:[%s2175_s7 + $0x18] sm:$0xff]   ;;  %v2019_v16 = vld [vmem:[%s2175_s7 + $0x20] sm:$0xff]   ;;  %v2021_v19 = vld [vmem:[%s2175_s7 + $0x28] sm:$0xff]  }
  0x18   : > { %1901 = vmatpush3.bf16.msra.mxu1 %v710_v7  ;;  %1835 = vmatmul.mubr.msk.bf16.vlgmr.msra.gmra.mrb[0].mxu0 %vm359_vm2, %v2014_v12  ;;  %v2018_v17 = vld [vmem:[%s2179_s9 + $0x18] sm:$0xff]   ;;  %v2020_v18 = vld [vmem:[%s2179_s9 + $0x20] sm:$0xff]   ;;  %v2023_v20 = vld [vmem:[%s2175_s7 + $0x30] sm:$0xff]  }
  0x19   : > { %1867 = vmatpush3.bf16.msra.mxu0 %v1047_v8  ;;  %1804 = vmatprep.mubr.msk.bf16.mxu1 %vm359_vm2, %v2015_v13  ;;  %v2022_v21 = vld [vmem:[%s2179_s9 + $0x28] sm:$0xff]   ;;  %v2024_v22 = vld [vmem:[%s2179_s9 + $0x30] sm:$0xff]   ;;  %v2025_v23 = vld [vmem:[%s2175_s7 + $0x38] sm:$0xff]  }
  0x1a   : > { %1838 = vmatprep.mubr.msk.bf16.mxu0 %vm359_vm2, %v2016_v14  ;;  %v2027_v24 = vld [vmem:[%s2175_s7 + $0x40] sm:$0xff]   ;;  %v2026_v25 = vld [vmem:[%s2179_s9 + $0x38] sm:$0xff]   ;;  %v2029_v27 = vld [vmem:[%s2175_s7 + $0x48] sm:$0xff]  }
  0x1b   : > { %v2028_v26 = vld [vmem:[%s2203_s20] sm:$0xff]   ;;  %v2031_v28 = vld [vmem:[%s2175_s7 + $0x50] sm:$0xff]   ;;  %v2030_v29 = vld [vmem:[%s2203_s20 + $0x8] sm:$0xff]  }
  0x1c   : > { %v2032_v30 = vld [vmem:[%s2203_s20 + $0x10] sm:$0xff]   ;;  %v2033_v31 = vld [vmem:[%s2175_s7 + $0x58] sm:$0xff]   ;;  %v2035_v32 = vld [vmem:[%s2175_s7 + $0x60] sm:$0xff]  }
  0x1d   : > { %v2034_v33 = vld [vmem:[%s2203_s20 + $0x18] sm:$0xff]   ;;  %v2036_v34 = vld [vmem:[%s2203_s20 + $0x20] sm:$0xff]   ;;  %v2037_v35 = vld [vmem:[%s2175_s7 + $0x68] sm:$0xff]  }
  0x1e   : > { %v2039_v36 = vld [vmem:[%s2175_s7 + $0x70] sm:$0xff]   ;;  %v2038_v37 = vld [vmem:[%s2203_s20 + $0x28] sm:$0xff]   ;;  %v2041_v39 = vld [vmem:[%s2175_s7 + $0x78] sm:$0xff]  }
  0x1f   : > { %1805 = vmatmul.mubr.msk.bf16.gmra.mrb[4].mxu1 %vm359_vm2, %v2017_v15  ;;  %v2040_v38 = vld [vmem:[%s2203_s20 + $0x30] sm:$0xff]   ;;  %v2043_v40 = vld [vmem:[%s2179_s9 + $0x40] sm:$0xff]   ;;  %v2042_v41 = vld [vmem:[%s2203_s20 + $0x38] sm:$0xff]  }
  0x20   : > { %1808 = vmatprep.mubr.msk.bf16.mxu1 %vm359_vm2, %v2019_v16  ;;  %1839 = vmatmul.mubr.msk.bf16.gmra.mrb[4].mxu0 %vm359_vm2, %v2018_v17  ;;  %v2044_v42 = vld [vmem:[%s2203_s20 + $0x40] sm:$0xff]   ;;  %v2045_v43 = vld [vmem:[%s2179_s9 + $0x48] sm:$0xff]   ;;  %v2047_v44 = vld [vmem:[%s2179_s9 + $0x50] sm:$0xff]  }
  0x21   : > { %1842 = vmatprep.mubr.msk.bf16.mxu0 %vm359_vm2, %v2020_v18  ;;  %v2046_v45 = vld [vmem:[%s2203_s20 + $0x48] sm:$0xff]   ;;  %v2048_v46 = vld [vmem:[%s2203_s20 + $0x50] sm:$0xff]   ;;  %v2049_v47 = vld [vmem:[%s2179_s9 + $0x58] sm:$0xff]  }
  0x22   : > { %v2051_v48 = vld [vmem:[%s2179_s9 + $0x60] sm:$0xff]   ;;  %v2050_v49 = vld [vmem:[%s2203_s20 + $0x58] sm:$0xff]   ;;  %v2053_v51 = vld [vmem:[%s2179_s9 + $0x68] sm:$0xff]  }
  0x23   : > { %v2052_v50 = vld [vmem:[%s2203_s20 + $0x60] sm:$0xff]   ;;  %v2055_v52 = vld [vmem:[%s2179_s9 + $0x70] sm:$0xff]   ;;  %v2054_v53 = vld [vmem:[%s2203_s20 + $0x68] sm:$0xff]  }
  0x24   : > { %v2056_v54 = vld [vmem:[%s2203_s20 + $0x70] sm:$0xff]   ;;  %v2057_v55 = vld [vmem:[%s2179_s9 + $0x78] sm:$0xff]   ;;  %v2299_v10 = vld [vmem:[%s2426_s2] ss:$0 sm:$0xff] }
  0x25   : > { %v2058_v56 = vld [vmem:[%s2203_s20 + $0x78] sm:$0xff]  }
  0x27   : > { %1809 = vmatmul.mubr.msk.bf16.gmra.mrb[8].mxu1 %vm359_vm2, %v2021_v19 }
  0x28   : > { %1812 = vmatprep.mubr.msk.bf16.mxu1 %vm359_vm2, %v2023_v20  ;;  %1843 = vmatmul.mubr.msk.bf16.gmra.mrb[8].mxu0 %vm359_vm2, %v2022_v21 }
  0x29   : > { %1846 = vmatprep.mubr.msk.bf16.mxu0 %vm359_vm2, %v2024_v22 }
  0x2f   : > { %1813 = vmatmul.mubr.msk.bf16.gmra.mrb[12].mxu1 %vm359_vm2, %v2025_v23 }
  0x30   : > { %1816 = vmatprep.mubr.msk.bf16.mxu1 %vm359_vm2, %v2027_v24  ;;  %1847 = vmatmul.mubr.msk.bf16.gmra.mrb[12].mxu0 %vm359_vm2, %v2026_v25 }
  0x31   : > { %1868 = vmatprep.mubr.msk.bf16.mxu0 %vm359_vm2, %v2028_v26 }
  0x37   : > { %1817 = vmatmul.mubr.msk.bf16.gmra.mrb[16].mxu1 %vm359_vm2, %v2029_v27 }
  0x38   : > { %1820 = vmatprep.mubr.msk.bf16.mxu1 %vm359_vm2, %v2031_v28  ;;  %1869 = vmatmul.mubr.msk.bf16.vlgmr.msra.gmra.mrb[0].mxu0 %vm359_vm2, %v2030_v29 }
  0x39   : > { %1872 = vmatprep.mubr.msk.bf16.mxu0 %vm359_vm2, %v2032_v30 }
  0x3f   : > { %1821 = vmatmul.mubr.msk.bf16.gmra.mrb[20].mxu1 %vm359_vm2, %v2033_v31 }
  0x40   : > { %1824 = vmatprep.mubr.msk.bf16.mxu1 %vm359_vm2, %v2035_v32  ;;  %1873 = vmatmul.mubr.msk.bf16.gmra.mrb[4].mxu0 %vm359_vm2, %v2034_v33 }
  0x41   : > { %1876 = vmatprep.mubr.msk.bf16.mxu0 %vm359_vm2, %v2036_v34 }
  0x47   : > { %1825 = vmatmul.mubr.msk.bf16.gmra.mrb[24].mxu1 %vm359_vm2, %v2037_v35 }
  0x48   : > { %1828 = vmatprep.mubr.msk.bf16.mxu1 %vm359_vm2, %v2039_v36  ;;  %1877 = vmatmul.mubr.msk.bf16.gmra.mrb[8].mxu0 %vm359_vm2, %v2038_v37 }
  0x49   : > { %1880 = vmatprep.mubr.msk.bf16.mxu0 %vm359_vm2, %v2040_v38 }
  0x4f   : > { %1829 = vmatmul.mubr.msk.bf16.gmra.mrb[28].mxu1 %vm359_vm2, %v2041_v39 }
  0x50   : > { %1850 = vmatprep.mubr.msk.bf16.mxu1 %vm359_vm2, %v2043_v40  ;;  %1881 = vmatmul.mubr.msk.bf16.gmra.mrb[12].mxu0 %vm359_vm2, %v2042_v41 }
  0x51   : > { %1884 = vmatprep.mubr.msk.bf16.mxu0 %vm359_vm2, %v2044_v42 }
  0x57   : > { %1851 = vmatmul.mubr.msk.bf16.vlgmr.msra.gmra.mrb[16].mxu1 %vm359_vm2, %v2045_v43 }
  0x58   : > { %1854 = vmatprep.mubr.msk.bf16.mxu1 %vm359_vm2, %v2047_v44  ;;  %1885 = vmatmul.mubr.msk.bf16.gmra.mrb[16].mxu0 %vm359_vm2, %v2046_v45 }
  0x59   : > { %1888 = vmatprep.mubr.msk.bf16.mxu0 %vm359_vm2, %v2048_v46 }
  0x5f   : > { %1855 = vmatmul.mubr.msk.bf16.gmra.mrb[20].mxu1 %vm359_vm2, %v2049_v47 }
  0x60   : > { %1858 = vmatprep.mubr.msk.bf16.mxu1 %vm359_vm2, %v2051_v48  ;;  %1889 = vmatmul.mubr.msk.bf16.gmra.mrb[20].mxu0 %vm359_vm2, %v2050_v49 }
  0x61   : > { %1892 = vmatprep.mubr.msk.bf16.mxu0 %vm359_vm2, %v2052_v50 }
  0x67   : > { %1859 = vmatmul.mubr.msk.bf16.gmra.mrb[24].mxu1 %vm359_vm2, %v2053_v51 }
  0x68   : > { %1862 = vmatprep.mubr.msk.bf16.mxu1 %vm359_vm2, %v2055_v52  ;;  %1893 = vmatmul.mubr.msk.bf16.gmra.mrb[24].mxu0 %vm359_vm2, %v2054_v53 }
  0x69   : > { %1896 = vmatprep.mubr.msk.bf16.mxu0 %vm359_vm2, %v2056_v54 }
  0x6f   : > { %1863 = vmatmul.mubr.msk.bf16.gmra.mrb[28].mxu1 %vm359_vm2, %v2057_v55 }
  0x70   : > { %1897 = vmatmul.mubr.msk.bf16.gmra.mrb[28].mxu0 %vm359_vm2, %v2058_v56 }
  0xea   : > { %v1802_v57 = vpop.f32.mrb[0].mxu1 }
  0xeb   : > { %v449_v58 = vpop.f32.mrb[1].mxu1 }
  0xec   : > { %v1803_v59 = vpop.f32.mrb[2].mxu1 }
  0xed   : > { %v452_v60 = vpop.f32.mrb[3].mxu1 }
  0xf2   : > { %v1806_v61 = vpop.f32.mrb[4].mxu1 }
  0xf3   : > { %v465_v62 = vpop.f32.mrb[5].mxu1 }
  0xf4   : > { %v1807_v63 = vpop.f32.mrb[6].mxu1 }
  0xf5   : > { %v468_v0 = vpop.f32.mrb[7].mxu1 }
  0xfa   : > { %v1810_v1 = vpop.f32.mrb[8].mxu1 }
  0xfb   : > { %v2280_v2 = vpop.f32.mrb[9].mxu1 }
  0xfc   : > { %v2282_v3 = vpop.f32.mrb[10].mxu1 }
  0xfd   : > { %v2284_v4 = vpop.f32.mrb[11].mxu1 }
 0x102   : > { %v2287_v5 = vpop.f32.mrb[12].mxu1 }
 0x103   : > { %v2289_v6 = vpop.f32.mrb[13].mxu1 }
 0x104   : > { %v2291_v7 = vpop.f32.mrb[14].mxu1 }
 0x105   : > { %v2293_v8 = vpop.f32.mrb[15].mxu1 }
 0x10b   : > { %v1870_v9 = vpop.f32.mrb[0].mxu0 }
 0x10c   : > { %v1902_v11 = vadd.f32 %v1870_v9, %v1802_v57  ;;  %v1083_v12 = vpop.f32.mrb[1].mxu0 }
 0x10d   : > { %v1903_v13 = vadd.f32 %v1083_v12, %v449_v58  ;;  %v1871_v14 = vpop.f32.mrb[2].mxu0 }
 0x10e   : > { %v1251_v15 = vadd.f32 %v1902_v11, %v2299_v10  ;;  %v1904_v16 = vadd.f32 %v1871_v14, %v1803_v59  ;;  %v1086_v17 = vpop.f32.mrb[3].mxu0 }
 0x10f   : > { %v1249_v18 = vadd.f32 %v1903_v13, %v2299_v10  ;;  %v1905_v19 = vadd.f32 %v1086_v17, %v452_v60 }
 0x110   : > { %v1283_v20 = vmax.f32 %v1251_v15, 0.0  ;;  %v1252_v21 = vadd.f32 %v1904_v16, %v2299_v10 }
 0x111   : > { %v1281_v22 = vmax.f32 %v1249_v18, 0.0  ;;  %v1250_v23 = vadd.f32 %v1905_v19, %v2299_v10 }
 0x112   : > { %v1717_v24 = vpack.c.bf16 %v1283_v20, %v1283_v20  ;;  %v1284_v25 = vmax.f32 %v1252_v21, 0.0 }
 0x113   : > { %v1715_v26 = vpack.c.bf16 %v1281_v22, %v1281_v22  ;;  %v1282_v27 = vmax.f32 %v1250_v23, 0.0  ;;  %v1874_v28 = vpop.f32.mrb[4].mxu0 }
 0x114   : > { %1444 = vst.msk [vmem:[%s2307_s27 + $0x8] sm:$0xf] %vm1441_vm3, %v1717_v24  ;;  %v1718_v29 = vpack.c.bf16 %v1284_v25, %v1284_v25  ;;  %v1906_v30 = vadd.f32 %v1874_v28, %v1806_v61  ;;  %v1099_v31 = vpop.f32.mrb[5].mxu0 }
 0x115   : > { %1442 = vst.msk [vmem:[%s2307_s27] sm:$0xf] %vm1441_vm3, %v1715_v26  ;;  %v1716_v32 = vpack.c.bf16 %v1282_v27, %v1282_v27  ;;  %v1907_v33 = vadd.f32 %v1099_v31, %v465_v62  ;;  %v1875_v34 = vpop.f32.mrb[6].mxu0 }
 0x116   : > { %1445 = vst.msk [vmem:[%s2307_s27 + $0xc] sm:$0xf] %vm1441_vm3, %v1718_v29  ;;  %v1255_v35 = vadd.f32 %v1906_v30, %v2299_v10  ;;  %v1908_v36 = vadd.f32 %v1875_v34, %v1807_v63  ;;  %v1102_v37 = vpop.f32.mrb[7].mxu0 }
 0x117   : > { %1443 = vst.msk [vmem:[%s2307_s27 + $0x4] sm:$0xf] %vm1441_vm3, %v1716_v32  ;;  %v1253_v38 = vadd.f32 %v1907_v33, %v2299_v10  ;;  %v1909_v39 = vadd.f32 %v1102_v37, %v468_v0 }
 0x118   : > { %v1287_v40 = vmax.f32 %v1255_v35, 0.0  ;;  %v1256_v41 = vadd.f32 %v1908_v36, %v2299_v10 }
 0x119   : > { %v1285_v42 = vmax.f32 %v1253_v38, 0.0  ;;  %v1254_v43 = vadd.f32 %v1909_v39, %v2299_v10 }
 0x11a   : > { %v1721_v44 = vpack.c.bf16 %v1287_v40, %v1287_v40  ;;  %v1288_v45 = vmax.f32 %v1256_v41, 0.0 }
 0x11b   : > { %v1719_v46 = vpack.c.bf16 %v1285_v42, %v1285_v42  ;;  %v1286_v47 = vmax.f32 %v1254_v43, 0.0  ;;  %v1878_v48 = vpop.f32.mrb[8].mxu0 }
 0x11c   : > { %1448 = vst.msk [vmem:[%s2307_s27 + $0x18] sm:$0xf] %vm1441_vm3, %v1721_v44  ;;  %v1722_v49 = vpack.c.bf16 %v1288_v45, %v1288_v45  ;;  %v1910_v50 = vadd.f32 %v1878_v48, %v1810_v1  ;;  %v1115_v51 = vpop.f32.mrb[9].mxu0 }
 0x11d   : > { %1446 = vst.msk [vmem:[%s2307_s27 + $0x10] sm:$0xf] %vm1441_vm3, %v1719_v46  ;;  %v1720_v52 = vpack.c.bf16 %v1286_v47, %v1286_v47  ;;  %v1911_v53 = vadd.f32 %v1115_v51, %v2280_v2  ;;  %v1879_v54 = vpop.f32.mrb[10].mxu0 }
 0x11e   : > { %1449 = vst.msk [vmem:[%s2307_s27 + $0x1c] sm:$0xf] %vm1441_vm3, %v1722_v49  ;;  %v1259_v55 = vadd.f32 %v1910_v50, %v2299_v10  ;;  %v1912_v56 = vadd.f32 %v1879_v54, %v2282_v3  ;;  %v1118_v57 = vpop.f32.mrb[11].mxu0 }
 0x11f   : > { %1447 = vst.msk [vmem:[%s2307_s27 + $0x14] sm:$0xf] %vm1441_vm3, %v1720_v52  ;;  %v1257_v58 = vadd.f32 %v1911_v53, %v2299_v10  ;;  %v1913_v59 = vadd.f32 %v1118_v57, %v2284_v4 }
 0x120   : > { %v1291_v60 = vmax.f32 %v1259_v55, 0.0  ;;  %v1260_v61 = vadd.f32 %v1912_v56, %v2299_v10 }
 0x121   : > { %v1289_v62 = vmax.f32 %v1257_v58, 0.0  ;;  %v1258_v63 = vadd.f32 %v1913_v59, %v2299_v10 }
 0x122   : > { %v1725_v0 = vpack.c.bf16 %v1291_v60, %v1291_v60  ;;  %v1292_v1 = vmax.f32 %v1260_v61, 0.0 }
 0x123   : > { %v1723_v2 = vpack.c.bf16 %v1289_v62, %v1289_v62  ;;  %v1290_v3 = vmax.f32 %v1258_v63, 0.0  ;;  %v1882_v9 = vpop.f32.mrb[12].mxu0 }
 0x124   : > { %1452 = vst.msk [vmem:[%s2307_s27 + $0x28] sm:$0xf] %vm1441_vm3, %v1725_v0  ;;  %v1726_v11 = vpack.c.bf16 %v1292_v1, %v1292_v1  ;;  %v1914_v12 = vadd.f32 %v1882_v9, %v2287_v5  ;;  %v1131_v13 = vpop.f32.mrb[13].mxu0 }
 0x125   : > { %1450 = vst.msk [vmem:[%s2307_s27 + $0x20] sm:$0xf] %vm1441_vm3, %v1723_v2  ;;  %v1724_v4 = vpack.c.bf16 %v1290_v3, %v1290_v3  ;;  %v1915_v14 = vadd.f32 %v1131_v13, %v2289_v6  ;;  %v1883_v15 = vpop.f32.mrb[14].mxu0 }
 0x126   : > { %1453 = vst.msk [vmem:[%s2307_s27 + $0x2c] sm:$0xf] %vm1441_vm3, %v1726_v11  ;;  %v1263_v16 = vadd.f32 %v1914_v12, %v2299_v10  ;;  %v1916_v17 = vadd.f32 %v1883_v15, %v2291_v7  ;;  %v1134_v18 = vpop.f32.mrb[15].mxu0 }
 0x127   : > { %1451 = vst.msk [vmem:[%s2307_s27 + $0x24] sm:$0xf] %vm1441_vm3, %v1724_v4  ;;  %v1261_v19 = vadd.f32 %v1915_v14, %v2299_v10  ;;  %v1917_v5 = vadd.f32 %v1134_v18, %v2293_v8 }
 0x128   : > { %v1295_v20 = vmax.f32 %v1263_v16, 0.0  ;;  %v1264_v21 = vadd.f32 %v1916_v17, %v2299_v10 }
 0x129   : > { %v1293_v6 = vmax.f32 %v1261_v19, 0.0  ;;  %v1262_v22 = vadd.f32 %v1917_v5, %v2299_v10 }
 0x12a   : > { %v1852_v23 = vpop.f32.mrb[16].mxu1  ;;  %v1729_v24 = vpack.c.bf16 %v1295_v20, %v1295_v20  ;;  %v1296_v25 = vmax.f32 %v1264_v21, 0.0 }
 0x12b   : > { %v810_v7 = vpop.f32.mrb[17].mxu1  ;;  %v1727_v26 = vpack.c.bf16 %v1293_v6, %v1293_v6  ;;  %v1294_v27 = vmax.f32 %v1262_v22, 0.0  ;;  %v1886_v28 = vpop.f32.mrb[16].mxu0 }
 0x12c   : > { %v1853_v29 = vpop.f32.mrb[18].mxu1  ;;  %1456 = vst.msk [vmem:[%s2307_s27 + $0x38] sm:$0xf] %vm1441_vm3, %v1729_v24  ;;  %v1730_v8 = vpack.c.bf16 %v1296_v25, %v1296_v25  ;;  %v1918_v30 = vadd.f32 %v1886_v28, %v1852_v23  ;;  %v1147_v31 = vpop.f32.mrb[17].mxu0 }
 0x12d   : > { %v813_v32 = vpop.f32.mrb[19].mxu1  ;;  %1454 = vst.msk [vmem:[%s2307_s27 + $0x30] sm:$0xf] %vm1441_vm3, %v1727_v26  ;;  %v1728_v33 = vpack.c.bf16 %v1294_v27, %v1294_v27  ;;  %v1919_v34 = vadd.f32 %v1147_v31, %v810_v7  ;;  %v1887_v35 = vpop.f32.mrb[18].mxu0 }
 0x12e   : > { %1457 = vst.msk [vmem:[%s2307_s27 + $0x3c] sm:$0xf] %vm1441_vm3, %v1730_v8  ;;  %v1267_v36 = vadd.f32 %v1918_v30, %v2299_v10  ;;  %v1920_v37 = vadd.f32 %v1887_v35, %v1853_v29  ;;  %v1150_v38 = vpop.f32.mrb[19].mxu0 }
 0x12f   : > { %1455 = vst.msk [vmem:[%s2307_s27 + $0x34] sm:$0xf] %vm1441_vm3, %v1728_v33  ;;  %v1265_v39 = vadd.f32 %v1919_v34, %v2299_v10  ;;  %v1921_v40 = vadd.f32 %v1150_v38, %v813_v32 }
 0x130   : > { %v1299_v41 = vmax.f32 %v1267_v36, 0.0  ;;  %v1268_v42 = vadd.f32 %v1920_v37, %v2299_v10 }
 0x131   : > { %v1297_v43 = vmax.f32 %v1265_v39, 0.0  ;;  %v1266_v44 = vadd.f32 %v1921_v40, %v2299_v10 }
 0x132   : > { %v1856_v45 = vpop.f32.mrb[20].mxu1  ;;  %v1733_v46 = vpack.c.bf16 %v1299_v41, %v1299_v41  ;;  %v1300_v47 = vmax.f32 %v1268_v42, 0.0 }
 0x133   : > { %v826_v48 = vpop.f32.mrb[21].mxu1  ;;  %v1731_v49 = vpack.c.bf16 %v1297_v43, %v1297_v43  ;;  %v1298_v50 = vmax.f32 %v1266_v44, 0.0  ;;  %v1890_v51 = vpop.f32.mrb[20].mxu0 }
 0x134   : > { %v1857_v52 = vpop.f32.mrb[22].mxu1  ;;  %1460 = vst.msk [vmem:[%s2307_s27 + $0x48] sm:$0xf] %vm1441_vm3, %v1733_v46  ;;  %v1734_v53 = vpack.c.bf16 %v1300_v47, %v1300_v47  ;;  %v1922_v54 = vadd.f32 %v1890_v51, %v1856_v45  ;;  %v1163_v55 = vpop.f32.mrb[21].mxu0 }
 0x135   : > { %v829_v56 = vpop.f32.mrb[23].mxu1  ;;  %1458 = vst.msk [vmem:[%s2307_s27 + $0x40] sm:$0xf] %vm1441_vm3, %v1731_v49  ;;  %v1732_v57 = vpack.c.bf16 %v1298_v50, %v1298_v50  ;;  %v1923_v58 = vadd.f32 %v1163_v55, %v826_v48  ;;  %v1891_v59 = vpop.f32.mrb[22].mxu0 }
 0x136   : > { %1461 = vst.msk [vmem:[%s2307_s27 + $0x4c] sm:$0xf] %vm1441_vm3, %v1734_v53  ;;  %v1271_v60 = vadd.f32 %v1922_v54, %v2299_v10  ;;  %v1924_v61 = vadd.f32 %v1891_v59, %v1857_v52  ;;  %v1166_v62 = vpop.f32.mrb[23].mxu0 }
 0x137   : > { %1459 = vst.msk [vmem:[%s2307_s27 + $0x44] sm:$0xf] %vm1441_vm3, %v1732_v57  ;;  %v1269_v63 = vadd.f32 %v1923_v58, %v2299_v10  ;;  %v1925_v0 = vadd.f32 %v1166_v62, %v829_v56 }
 0x138   : > { %v1303_v1 = vmax.f32 %v1271_v60, 0.0  ;;  %v1272_v2 = vadd.f32 %v1924_v61, %v2299_v10 }
 0x139   : > { %v1301_v3 = vmax.f32 %v1269_v63, 0.0  ;;  %v1270_v9 = vadd.f32 %v1925_v0, %v2299_v10 }
 0x13a   : > { %v1860_v11 = vpop.f32.mrb[24].mxu1  ;;  %v1737_v12 = vpack.c.bf16 %v1303_v1, %v1303_v1  ;;  %v1304_v13 = vmax.f32 %v1272_v2, 0.0 }
 0x13b   : > { %v842_v4 = vpop.f32.mrb[25].mxu1  ;;  %v1735_v14 = vpack.c.bf16 %v1301_v3, %v1301_v3  ;;  %v1302_v15 = vmax.f32 %v1270_v9, 0.0  ;;  %v1894_v16 = vpop.f32.mrb[24].mxu0 }
 0x13c   : > { %v1861_v17 = vpop.f32.mrb[26].mxu1  ;;  %1464 = vst.msk [vmem:[%s2307_s27 + $0x58] sm:$0xf] %vm1441_vm3, %v1737_v12  ;;  %v1738_v18 = vpack.c.bf16 %v1304_v13, %v1304_v13  ;;  %v1926_v19 = vadd.f32 %v1894_v16, %v1860_v11  ;;  %v1179_v5 = vpop.f32.mrb[25].mxu0 }
 0x13d   : > { %v845_v20 = vpop.f32.mrb[27].mxu1  ;;  %1462 = vst.msk [vmem:[%s2307_s27 + $0x50] sm:$0xf] %vm1441_vm3, %v1735_v14  ;;  %v1736_v21 = vpack.c.bf16 %v1302_v15, %v1302_v15  ;;  %v1927_v6 = vadd.f32 %v1179_v5, %v842_v4  ;;  %v1895_v22 = vpop.f32.mrb[26].mxu0 }
 0x13e   : > { %1465 = vst.msk [vmem:[%s2307_s27 + $0x5c] sm:$0xf] %vm1441_vm3, %v1738_v18  ;;  %v1275_v23 = vadd.f32 %v1926_v19, %v2299_v10  ;;  %v1928_v24 = vadd.f32 %v1895_v22, %v1861_v17  ;;  %v1182_v25 = vpop.f32.mrb[27].mxu0 }
 0x13f   : > { %1463 = vst.msk [vmem:[%s2307_s27 + $0x54] sm:$0xf] %vm1441_vm3, %v1736_v21  ;;  %v1273_v7 = vadd.f32 %v1927_v6, %v2299_v10  ;;  %v1929_v26 = vadd.f32 %v1182_v25, %v845_v20 }
 0x140   : > { %v1307_v27 = vmax.f32 %v1275_v23, 0.0  ;;  %v1276_v28 = vadd.f32 %v1928_v24, %v2299_v10 }
 0x141   : > { %v1305_v29 = vmax.f32 %v1273_v7, 0.0  ;;  %v1274_v8 = vadd.f32 %v1929_v26, %v2299_v10 }
 0x142   : > { %v1864_v30 = vpop.f32.mrb[28].mxu1  ;;  %v1741_v31 = vpack.c.bf16 %v1307_v27, %v1307_v27  ;;  %v1308_v32 = vmax.f32 %v1276_v28, 0.0 }
 0x143   : > { %v858_v33 = vpop.f32.mrb[29].mxu1  ;;  %v1739_v34 = vpack.c.bf16 %v1305_v29, %v1305_v29  ;;  %v1306_v35 = vmax.f32 %v1274_v8, 0.0  ;;  %v1898_v36 = vpop.f32.mrb[28].mxu0 }
 0x144   : > { %v1865_v37 = vpop.f32.mrb[30].mxu1  ;;  %1468 = vst.msk [vmem:[%s2307_s27 + $0x68] sm:$0xf] %vm1441_vm3, %v1741_v31  ;;  %v1742_v38 = vpack.c.bf16 %v1308_v32, %v1308_v32  ;;  %v1930_v39 = vadd.f32 %v1898_v36, %v1864_v30  ;;  %v1195_v40 = vpop.f32.mrb[29].mxu0 }
 0x145   : > { %v861_v41 = vpop.f32.mrb[31].mxu1  ;;  %1466 = vst.msk [vmem:[%s2307_s27 + $0x60] sm:$0xf] %vm1441_vm3, %v1739_v34  ;;  %v1740_v42 = vpack.c.bf16 %v1306_v35, %v1306_v35  ;;  %v1931_v43 = vadd.f32 %v1195_v40, %v858_v33  ;;  %v1899_v44 = vpop.f32.mrb[30].mxu0 }
 0x146   : > { %1469 = vst.msk [vmem:[%s2307_s27 + $0x6c] sm:$0xf] %vm1441_vm3, %v1742_v38  ;;  %v1279_v45 = vadd.f32 %v1930_v39, %v2299_v10  ;;  %v1932_v46 = vadd.f32 %v1899_v44, %v1865_v37  ;;  %v1198_v47 = vpop.f32.mrb[31].mxu0 }
 0x147   : > { %1467 = vst.msk [vmem:[%s2307_s27 + $0x64] sm:$0xf] %vm1441_vm3, %v1740_v42  ;;  %v1277_v48 = vadd.f32 %v1931_v43, %v2299_v10  ;;  %v1933_v49 = vadd.f32 %v1198_v47, %v861_v41 }
 0x148   : > { %v1311_v50 = vmax.f32 %v1279_v45, 0.0  ;;  %v1280_v51 = vadd.f32 %v1932_v46, %v2299_v10 }
 0x149   : > { %v1309_v52 = vmax.f32 %v1277_v48, 0.0  ;;  %v1278_v53 = vadd.f32 %v1933_v49, %v2299_v10 }
 0x14a   : > { %v1745_v54 = vpack.c.bf16 %v1311_v50, %v1311_v50  ;;  %v1312_v55 = vmax.f32 %v1280_v51, 0.0 }
 0x14b   : > { %v1743_v56 = vpack.c.bf16 %v1309_v52, %v1309_v52  ;;  %v1310_v57 = vmax.f32 %v1278_v53, 0.0 }
 0x14c   : > { %1472 = vst.msk [vmem:[%s2307_s27 + $0x78] sm:$0xf] %vm1441_vm3, %v1745_v54  ;;  %v1746_v58 = vpack.c.bf16 %v1312_v55, %v1312_v55 }
 0x14d   : > { %1470 = vst.msk [vmem:[%s2307_s27 + $0x70] sm:$0xf] %vm1441_vm3, %v1743_v56  ;;  %v1744_v59 = vpack.c.bf16 %v1310_v57, %v1310_v57 }
 0x14e   : > { %1473 = vst.msk [vmem:[%s2307_s27 + $0x7c] sm:$0xf] %vm1441_vm3, %v1746_v58 }
 0x14f   : > { %1471 = vst.msk [vmem:[%s2307_s27 + $0x74] sm:$0xf] %vm1441_vm3, %v1744_v59 }
 0x150 PF: > { %s13_s16 = sadd.s32 1, %s2097_s16   ;;  %s2428_s12 = smov %s2089_s14 }
 0x151   : > { %p10_p7 = scmp.ge.s32.totalorder %s13_s16, 10   ;;  %s2429_s13 = smov %s2093_s15 }
 0x152   : > { %s2430_s14 = smov %s2433_s17  ;;  %s2431_s15 = smov %s2437_s18 }
 0x153   :  { %12 = sbr.rel (!%p10_p7) target bundleno = 3 (0x3), region = 67 }

</bundles_post_ra>
